<compile_context>
chip_gen: v6e
topology: v6e:2x2x1
jax: 0.10.0
libtpu: 0.0.40
codegen_flags: <defaults>
</compile_context>

<pallas_src>
import numpy as np
import jax
import jax.numpy as jnp
from jax.experimental import pallas as pl
from jax.experimental.pallas import tpu as pltpu

N_FFT = 512
HOP = N_FFT // 4            # torch.stft default hop_length = n_fft // 4
N_FREQ = N_FFT // 2 + 1     # 257 one-sided bins
F_PAD = 384                 # 257 padded to a lane multiple (3 x 128)
W_COLS = 640                # [re k=0..255 | im k=0..255 | re k=256, zero pad]
TIME_TILE = 256             # frames per kernel-1 grid step for long signals

_PI = np.float32(np.pi)
_HALF_PI = np.float32(np.pi / 2.0)
_TWO_PI = np.float32(2.0 * np.pi)
_INV_TWO_PI = np.float32(1.0 / (2.0 * np.pi))
_INV_PI = np.float32(1.0 / np.pi)


# ------------------------- in-kernel branchless atan2 ----------------------- #
def _atan2(y, x):
    """float32 atan2(y, x) from basic VPU ops (matches np/torch conventions for
    the cases reachable here, incl. atan2(0, 0) == 0 and atan2(0, x<0) == pi)."""
    ax = jnp.abs(x)
    ay = jnp.abs(y)
    mx = jnp.maximum(ax, ay)
    mn = jnp.minimum(ax, ay)
    a = mn / jnp.where(mx == 0.0, np.float32(1.0), mx)          # a in [0, 1]
    # SLEEF-style minimax polynomial for atan(a) on [0, 1].
    s = a * a
    u = np.float32(2.8236389625817537e-03)
    u = u * s + np.float32(-1.5956902876496315e-02)
    u = u * s + np.float32(4.2504988610744476e-02)
    u = u * s + np.float32(-7.4890092015266418e-02)
    u = u * s + np.float32(1.0634793341159821e-01)
    u = u * s + np.float32(-1.4202736318111420e-01)
    u = u * s + np.float32(1.9992695748805999e-01)
    u = u * s + np.float32(-3.3333101868629456e-01)
    r = a + a * (s * u)
    r = jnp.where(ay > ax, _HALF_PI - r, r)                     # |y/x| > 1
    r = jnp.where(x < 0.0, _PI - r, r)                          # left half-plane
    return jnp.where(y < 0.0, -r, r)                            # lower half-plane


# --------------------- Kernel 1: windowed DFT + phase ----------------------- #
def _stft_phase_kernel(f_ref, w_ref, ph_ref):
    x = f_ref[0]                                                # (TT, 512)
    mm = jnp.dot(x, w_ref[...], preferred_element_type=jnp.float32)  # (TT, 640)
    re = mm[:, 0:256]                                           # bins 0..255 real
    im = mm[:, 256:512]                                         # bins 0..255 imag
    ph_lo = _atan2(im, re)                                      # (TT, 256)
    re_hi = mm[:, 512:640]                                      # col 0 = Nyquist real; imag == 0
    ph_hi = jnp.where(re_hi < 0.0, _PI, np.float32(0.0))        # angle(real + 0j)
    ph_ref[0] = jnp.concatenate([ph_lo, ph_hi], axis=-1)        # (TT, 384) lane-dense


# --------------------- Kernel 2: instantaneous frequency -------------------- #
def _if_kernel(p_ref, o_ref):
    p = p_ref[0]                                                # (T, F_PAD) phase
    dd = p[1:, :] - p[:-1, :]                                   # diff along time (VPU)
    tmp = dd + _PI
    ddmod = tmp - _TWO_PI * jnp.floor(tmp * _INV_TWO_PI) - _PI  # wrap to [-pi, pi)
    fix = jnp.logical_and(ddmod == -_PI, dd > 0.0)
    ddmod = jnp.where(fix, _PI, ddmod)
    # out[0] = p[0]/pi ; out[t>=1] = ddmod[t-1]/pi  (cumsum & final diff cancel)
    o_ref[0] = jnp.concatenate([p[0:1, :], ddmod], axis=0) * _INV_PI


# ------------------------------ weight builder ------------------------------ #
def _dft_phase_weight():
    n = np.arange(N_FFT, dtype=np.float64)
    win = 0.5 - 0.5 * np.cos(2.0 * np.pi * n / N_FFT)           # periodic hann(512)
    k = np.arange(256, dtype=np.float64)
    ang = 2.0 * np.pi * np.outer(n, k) / N_FFT                  # (512, 256)
    w = np.zeros((N_FFT, W_COLS), dtype=np.float32)
    w[:, 0:256] = win[:, None] * np.cos(ang)                    # real, k = 0..255
    w[:, 256:512] = -win[:, None] * np.sin(ang)                 # imag, k = 0..255
    w[:, 256] = 0.0                                             # k=0 imag exactly 0
    w[:, 512] = win * np.cos(np.pi * n)                         # k=256 real; imag exactly 0
    return w


# --------------------------------- wrapper ---------------------------------- #
def if_forward(wav):
    """Equivalent of IF.forward(wav). wav: (B, L) float32 -> (B, T, 257) float32."""
    b, length = wav.shape
    # torch.stft defaults: center=True -> reflect-pad n_fft//2 on each side.
    xpad = jnp.pad(wav, ((0, 0), (N_FFT // 2, N_FFT // 2)), mode="reflect")
    t = 1 + length // HOP
    gather_idx = (jnp.arange(t) * HOP)[:, None] + jnp.arange(N_FFT)[None, :]
    # TODO(synk): this gather materializes a 4x-expanded (B, T, 512) frames copy in
    # HBM; building the 75%-overlapping frames in-kernel from the padded wav
    # (manual DMA / halo blocks) would cut kernel-1 input traffic ~4x.
    frames = xpad[:, gather_idx].astype(jnp.float32)            # (B, T, 512)

    w = jnp.asarray(_dft_phase_weight())                        # (512, 640), ~1.3 MiB
    tt = t if t <= TIME_TILE else TIME_TILE

    phase = pl.pallas_call(
        _stft_phase_kernel,
        out_shape=jax.ShapeDtypeStruct((b, t, F_PAD), jnp.float32),
        grid_spec=pltpu.PrefetchScalarGridSpec(
            num_scalar_prefetch=0,
            grid=(b, pl.cdiv(t, tt)),
            in_specs=[
                pl.BlockSpec((1, tt, N_FFT), lambda i, j: (i, j, 0)),
                pl.BlockSpec((N_FFT, W_COLS), lambda i, j: (0, 0)),  # VMEM resident
            ],
            out_specs=pl.BlockSpec((1, tt, F_PAD), lambda i, j: (i, j, 0)),
        ),
        compiler_params=pltpu.CompilerParams(
            dimension_semantics=("parallel", "parallel"),
            vmem_limit_bytes=32 * 1024 * 1024),
    )(frames, w)

    # TODO(synk): for very long audio, grid kernel 2 over (B, time tiles) with a
    # 1-row halo instead of one full (1, T, F_PAD) block per batch element.
    out = pl.pallas_call(
        _if_kernel,
        out_shape=jax.ShapeDtypeStruct((b, t, F_PAD), jnp.float32),
        grid_spec=pltpu.PrefetchScalarGridSpec(
            num_scalar_prefetch=0,
            grid=(b,),
            in_specs=[pl.BlockSpec((1, t, F_PAD), lambda i: (i, 0, 0))],
            out_specs=pl.BlockSpec((1, t, F_PAD), lambda i: (i, 0, 0)),
        ),
        compiler_params=pltpu.CompilerParams(
            dimension_semantics=("parallel",)),
    )(phase)

    return out[:, :, :N_FREQ]                                   # drop lane padding


if __name__ == "__main__":
    key = jax.random.PRNGKey(0)
    B, L = 2, 1024
    wav = jax.random.normal(key, (B, L), dtype=jnp.float32)

    out = if_forward(wav)
    out = jax.block_until_ready(out)

    expected_t = 1 + L // HOP
    assert out.shape == (B, expected_t, N_FREQ), out.shape
    assert out.dtype == jnp.float32
    assert bool(jnp.all(jnp.isfinite(out)))
    print("KERNEL_OK")
</pallas_src>

<mosaic_0001>
module attributes {stable_mosaic.version = 11 : i64} {
  func.func @_stft_phase_kernel(%arg0: i32, %arg1: i32, %arg2: memref<1x9x512xf32, #tpu.memory_space<vmem>>, %arg3: memref<512x640xf32, #tpu.memory_space<vmem>>, %arg4: memref<1x9x384xf32, #tpu.memory_space<vmem>>) attributes {dimension_semantics = [#tpu.dimension_semantics<parallel>, #tpu.dimension_semantics<parallel>], iteration_bounds = array<i64: 2, 1>, scalar_prefetch = 0 : i64, scratch_operands = 0 : i64, tpu.core_type = #tpu.core_type<tc>, window_params = [{transform_indices = @transform_0, window_bounds = array<i64: 1, 9, 512>}, {pipeline_mode = #tpu.pipeline_mode<synchronous>, transform_indices = @transform_1, window_bounds = array<i64: 512, 640>}, {transform_indices = @transform_2, window_bounds = array<i64: 1, 9, 384>}]} {
    %c0 = arith.constant 0 : index
    %c0_0 = arith.constant 0 : index
    %c0_1 = arith.constant 0 : index
    %0 = vector.load %arg2[%c0, %c0_0, %c0_1] : memref<1x9x512xf32, #tpu.memory_space<vmem>>, vector<1x9x512xf32>
    %1 = vector.shape_cast %0 : vector<1x9x512xf32> to vector<9x512xf32>
    %c0_2 = arith.constant 0 : index
    %c0_3 = arith.constant 0 : index
    %2 = vector.load %arg3[%c0_2, %c0_3] : memref<512x640xf32, #tpu.memory_space<vmem>>, vector<512x640xf32>
    %cst = arith.constant dense<0.000000e+00> : vector<9x640xf32>
    %3 = tpu.matmul %1, %2, %cst {dimension_numbers = #tpu.dot_dimension_numbers<[1], [0], [0], [1], [0, 0, 1, 1], [], []>} : vector<9x512xf32>, vector<512x640xf32>, vector<9x640xf32> -> vector<9x640xf32>
    %4 = vector.extract_strided_slice %3 {offsets = [0, 0], sizes = [9, 256], strides = [1, 1]} : vector<9x640xf32> to vector<9x256xf32>
    %5 = vector.extract_strided_slice %3 {offsets = [0, 256], sizes = [9, 256], strides = [1, 1]} : vector<9x640xf32> to vector<9x256xf32>
    %6 = math.absf %4 : vector<9x256xf32>
    %7 = math.absf %5 : vector<9x256xf32>
    %8 = arith.maximumf %6, %7 : vector<9x256xf32>
    %9 = arith.minimumf %6, %7 : vector<9x256xf32>
    %cst_4 = arith.constant 0.000000e+00 : f32
    %10 = vector.broadcast %cst_4 : f32 to vector<9x256xf32>
    %11 = arith.cmpf oeq, %8, %10 : vector<9x256xf32>
    %cst_5 = arith.constant 1.000000e+00 : f32
    %12 = vector.broadcast %cst_5 : f32 to vector<9x256xf32>
    %13 = arith.select %11, %12, %8 : vector<9x256xi1>, vector<9x256xf32>
    %14 = arith.divf %9, %13 : vector<9x256xf32>
    %15 = arith.mulf %14, %14 : vector<9x256xf32>
    %cst_6 = arith.constant 0.00282363896 : f32
    %16 = vector.broadcast %cst_6 : f32 to vector<9x256xf32>
    %17 = arith.mulf %16, %15 : vector<9x256xf32>
    %cst_7 = arith.constant -0.0159569029 : f32
    %18 = vector.broadcast %cst_7 : f32 to vector<9x256xf32>
    %19 = arith.addf %17, %18 : vector<9x256xf32>
    %20 = arith.mulf %19, %15 : vector<9x256xf32>
    %cst_8 = arith.constant 0.0425049886 : f32
    %21 = vector.broadcast %cst_8 : f32 to vector<9x256xf32>
    %22 = arith.addf %20, %21 : vector<9x256xf32>
    %23 = arith.mulf %22, %15 : vector<9x256xf32>
    %cst_9 = arith.constant -0.074890092 : f32
    %24 = vector.broadcast %cst_9 : f32 to vector<9x256xf32>
    %25 = arith.addf %23, %24 : vector<9x256xf32>
    %26 = arith.mulf %25, %15 : vector<9x256xf32>
    %cst_10 = arith.constant 0.106347933 : f32
    %27 = vector.broadcast %cst_10 : f32 to vector<9x256xf32>
    %28 = arith.addf %26, %27 : vector<9x256xf32>
    %29 = arith.mulf %28, %15 : vector<9x256xf32>
    %cst_11 = arith.constant -0.142027363 : f32
    %30 = vector.broadcast %cst_11 : f32 to vector<9x256xf32>
    %31 = arith.addf %29, %30 : vector<9x256xf32>
    %32 = arith.mulf %31, %15 : vector<9x256xf32>
    %cst_12 = arith.constant 0.199926957 : f32
    %33 = vector.broadcast %cst_12 : f32 to vector<9x256xf32>
    %34 = arith.addf %32, %33 : vector<9x256xf32>
    %35 = arith.mulf %34, %15 : vector<9x256xf32>
    %cst_13 = arith.constant -0.333331019 : f32
    %36 = vector.broadcast %cst_13 : f32 to vector<9x256xf32>
    %37 = arith.addf %35, %36 : vector<9x256xf32>
    %38 = arith.mulf %15, %37 : vector<9x256xf32>
    %39 = arith.mulf %14, %38 : vector<9x256xf32>
    %40 = arith.addf %14, %39 : vector<9x256xf32>
    %41 = arith.cmpf ogt, %7, %6 : vector<9x256xf32>
    %cst_14 = arith.constant 1.57079637 : f32
    %42 = vector.broadcast %cst_14 : f32 to vector<9x256xf32>
    %43 = arith.subf %42, %40 : vector<9x256xf32>
    %44 = arith.select %41, %43, %40 : vector<9x256xi1>, vector<9x256xf32>
    %cst_15 = arith.constant 0.000000e+00 : f32
    %45 = vector.broadcast %cst_15 : f32 to vector<9x256xf32>
    %46 = arith.cmpf olt, %4, %45 : vector<9x256xf32>
    %cst_16 = arith.constant 3.14159274 : f32
    %47 = vector.broadcast %cst_16 : f32 to vector<9x256xf32>
    %48 = arith.subf %47, %44 : vector<9x256xf32>
    %49 = arith.select %46, %48, %44 : vector<9x256xi1>, vector<9x256xf32>
    %cst_17 = arith.constant 0.000000e+00 : f32
    %50 = vector.broadcast %cst_17 : f32 to vector<9x256xf32>
    %51 = arith.cmpf olt, %5, %50 : vector<9x256xf32>
    %cst_18 = arith.constant 0.000000e+00 : f32
    %52 = vector.broadcast %cst_18 : f32 to vector<9x256xf32>
    %53 = arith.subf %52, %49 : vector<9x256xf32>
    %54 = arith.select %51, %53, %49 : vector<9x256xi1>, vector<9x256xf32>
    %55 = vector.extract_strided_slice %3 {offsets = [0, 512], sizes = [9, 128], strides = [1, 1]} : vector<9x640xf32> to vector<9x128xf32>
    %cst_19 = arith.constant 0.000000e+00 : f32
    %56 = vector.broadcast %cst_19 : f32 to vector<9x128xf32>
    %57 = arith.cmpf olt, %55, %56 : vector<9x128xf32>
    %cst_20 = arith.constant 3.14159274 : f32
    %cst_21 = arith.constant 0.000000e+00 : f32
    %58 = vector.broadcast %cst_20 : f32 to vector<9x128xf32>
    %59 = vector.broadcast %cst_21 : f32 to vector<9x128xf32>
    %60 = arith.select %57, %58, %59 : vector<9x128xi1>, vector<9x128xf32>
    %61 = tpu.concatenate %54, %60 in 1 : vector<9x256xf32>, vector<9x128xf32> -> vector<9x384xf32>
    %c0_22 = arith.constant 0 : index
    %c0_23 = arith.constant 0 : index
    %c0_24 = arith.constant 0 : index
    %62 = vector.load %arg4[%c0_22, %c0_23, %c0_24] : memref<1x9x384xf32, #tpu.memory_space<vmem>>, vector<1x9x384xf32>
    %63 = vector.shape_cast %62 : vector<1x9x384xf32> to vector<9x384xf32>
    %64 = vector.shape_cast %61 : vector<9x384xf32> to vector<1x9x384xf32>
    tpu.vector_store %arg4[%c0_22, %c0_23, %c0_24], %64 {strides = array<i32>} : memref<1x9x384xf32, #tpu.memory_space<vmem>>, vector<1x9x384xf32>,
    return
  }
  func.func @transform_0(%arg0: i32, %arg1: i32) -> (i32, i32, i32) {
    %c0_i32 = arith.constant 0 : i32
    %c0_i32_0 = arith.constant 0 : i32
    return %arg0, %arg1, %c0_i32 : i32, i32, i32
  }
  func.func @transform_1(%arg0: i32, %arg1: i32) -> (i32, i32) {
    %c0_i32 = arith.constant 0 : i32
    %c0_i32_0 = arith.constant 0 : i32
    %c0_i32_1 = arith.constant 0 : i32
    return %c0_i32, %c0_i32_0 : i32, i32
  }
  func.func @transform_2(%arg0: i32, %arg1: i32) -> (i32, i32, i32) {
    %c0_i32 = arith.constant 0 : i32
    %c0_i32_0 = arith.constant 0 : i32
    return %arg0, %arg1, %c0_i32 : i32, i32, i32
  }
}

</mosaic_0001>

<bundles_post_ra>
// kernel: tpu_custom_call.1
= control target key start
LH: loop header
LB: loop body
LE: loop exit
PB: predicated region body
PF: predicated region fallthrough
CT: control target
= control target key end

     0   :  { %7 = vsyncpa [#allocation3], 0  ;;  %s1456_s9 = smov 0   ;;  %s1458_s10 = smov 0   ;;  %s1715_s0 = inlined_call_operand.vmem [shape: f32[2,9,512], index: 0, kind: input, shape index: {}]   ;;  %s1716_s1 = inlined_call_operand.hbm [shape: f32[512,640], index: 1, kind: input, shape index: {}]   ;;  %s1717_s2 = inlined_call_operand.vmem [shape: f32[2,9,384], index: 2, kind: output, shape index: {}]  }
   0x1   :  { %s1460_s11 = smov 0  }
   0x2 LB: > { %s1247_s12 = sadd.s32 4294967295, %s1435_s11   ;;  %s25_s13 = sadd.s32 1, %s1431_s10  ;;  %s1435_s11 = sphi %s1460_s11, %s13_s11   ;;  %s1431_s10 = sphi %s1458_s10, %s1721_s10   ;;  %s1427_s9 = sphi %s1456_s9, %s1720_s9  }
   0x3   : > { %p27_p0 = scmp.ge.s32.totalorder %s25_s13, 2  ;;  %p1249_p1 = scmp.ge.s32.totalorder %s1435_s11, 1 }
   0x4   : > { %p107_p2 = scmp.lt.s32.totalorder %s1435_s11, 3  ;;  %p1481_p4 = scmp.eq.s32.totalorder %s1247_s12, 0 }
   0x5   : > { %s1723_s13 = smov (%p27_p0, %s25_s13), 0  ;;  %s1437_s16 = smov [#allocation2]  }
   0x6   : > { %p1477_p3 = pnand %p1249_p1, %p107_p2  ;;  %s119_s17 = sshll.u32 %s1437_s16, 4  ;;  %s120_s17 = int_to_ptr.vmem [resolvable:$true] %s119_s17 }
   0x7   : > { %s1394_s18 = scalar_lea.vmem %s120_s17, 40960  ;;  %p1402_p11 = scmp.lt.s32.totalorder %s120_s17, %s120_s17 }
   0x8   : > { %p1341_p5 = pneg %p1477_p3  ;;  %p1395_p8 = scmp.ne.s32.totalorder %s120_s17, %s1394_s18 }
   0x9   : > { %p1403_p12 = scmp.lt.s32.totalorder %s1394_s18, %s1394_s18 }
   0xa   : > { %p1342_p6 = pnand %p1481_p4, %p1341_p5 }
   0xb   : > { %p1404_p13 = por %p1403_p12, %p1402_p11 }
   0xc   : > { %p1385_p7 = pneg %p1342_p6 }
   0xe   : > { %p1397_p9 = pnand %p1395_p8, %p1385_p7 }
  0x10   : > { %p1398_p10 = pneg %p1397_p9 }
  0x12   : > { %p1405_p0 = pnand %p1404_p13, %p1398_p10 }
  0x14   : > { %1408 = shalt.err (!%p1405_p0)
}
  0x15   : > { %s1438_s19 = smov 640   ;;  %s1439_s20 = smov 40  }
  0x16   : > { %1344 = dma.hbm_to_vmem [thread:$0]  (!%p1342_p6), %s1716_s1, 40960, %s120_s17, [#allocation3], %s1438_s19, %s1438_s19, %s1439_s20  }
  0x17   : > { %149 = sbr.rel (%p1477_p3) target bundleno = 434 (0x1b2), region = 28 }
  0x1c   : > { %1422 = dma.done.wait (%p1481_p4), [#allocation3], 40960  }
  0x1d   : > { %1424 = vsyncadd (%p1481_p4), [#allocation3], 4294926336  ;;  %v287_v0 = vld [vmem:[#allocation2 + $0x260] sm:$0xff]  ;;  %v286_v2 = vld [vmem:[#allocation2 + $0x258] sm:$0xff]  ;;  %p182_p1 = scmp.lt.s32.totalorder %s1427_s9, 1 }
  0x1e   : > { %v447_v1 = vld [vmem:[#allocation2 + $0x760] sm:$0xff]  ;;  %531 = vmatprep.subr.mxu0 %v287_v0  ;;  %v446_v3 = vld [vmem:[#allocation2 + $0x758] sm:$0xff]  ;;  %v281_v6 = vld [vmem:[#allocation2 + $0x230] sm:$0xff] }
  0x1f   : > { %608 = vmatprep.subr.mxu1 %v447_v1  ;;  %v282_v4 = vld [vmem:[#allocation2 + $0x238] sm:$0xff]  ;;  %532 = vmatpush1.msra.mxu0 %v286_v2  ;;  %v441_v7 = vld [vmem:[#allocation2 + $0x730] sm:$0xff]  ;;  %v276_v10 = vld [vmem:[#allocation2 + $0x208] sm:$0xff]  ;;  %s1725_s9 = smov (!%p182_p1, %s1427_s9), 1 }
  0x20   : > { %v442_v5 = vld [vmem:[#allocation2 + $0x738] sm:$0xff]  ;;  %609 = vmatpush1.msra.mxu1 %v446_v3  ;;  %v277_v8 = vld [vmem:[#allocation2 + $0x210] sm:$0xff]  ;;  %533 = vmatprep.subr.mxu0 %v282_v4  ;;  %v436_v11 = vld [vmem:[#allocation2 + $0x708] sm:$0xff]  ;;  %s1259_s23 = sshll.u32 %s1725_s9, 6  ;;  %s1336_s27 = smul.u32 48, %s1725_s9 }
  0x21   : > { %610 = vmatprep.subr.mxu1 %v442_v5  ;;  %v437_v9 = vld [vmem:[#allocation2 + $0x710] sm:$0xff]  ;;  %534 = vmatpush1.msra.mxu0 %v281_v6  ;;  %v272_v12 = vld [vmem:[#allocation2 + $0x1e8] sm:$0xff]  ;;  %v271_v14 = vld [vmem:[#allocation2 + $0x1e0] sm:$0xff]  ;;  %s1508_s26 = scalar_lea.vmem %s1715_s0, %s1259_s23 }
  0x22   : > { %611 = vmatpush1.msra.mxu1 %v441_v7  ;;  %v432_v13 = vld [vmem:[#allocation2 + $0x6e8] sm:$0xff]  ;;  %535 = vmatprep.subr.mxu0 %v277_v8  ;;  %v431_v15 = vld [vmem:[#allocation2 + $0x6e0] sm:$0xff]  ;;  %v266_v18 = vld [vmem:[#allocation2 + $0x1b8] sm:$0xff]  ;;  %s1655_s30 = scalar_lea.vmem %s1717_s2, %s1336_s27 }
  0x23   : > { %612 = vmatprep.subr.mxu1 %v437_v9  ;;  %536 = vmatpush1.msra.mxu0 %v276_v10  ;;  %v267_v16 = vld [vmem:[#allocation2 + $0x1c0] sm:$0xff]  ;;  %v426_v19 = vld [vmem:[#allocation2 + $0x6b8] sm:$0xff]  ;;  %v261_v22 = vld [vmem:[#allocation2 + $0x190] sm:$0xff] }
  0x24   : > { %613 = vmatpush1.msra.mxu1 %v436_v11  ;;  %v427_v17 = vld [vmem:[#allocation2 + $0x6c0] sm:$0xff]  ;;  %537 = vmatprep.subr.mxu0 %v272_v12  ;;  %v262_v20 = vld [vmem:[#allocation2 + $0x198] sm:$0xff]  ;;  %v421_v23 = vld [vmem:[#allocation2 + $0x690] sm:$0xff] }
  0x25   : > { %614 = vmatprep.subr.mxu1 %v432_v13  ;;  %538 = vmatpush1.msra.mxu0 %v271_v14  ;;  %v422_v21 = vld [vmem:[#allocation2 + $0x698] sm:$0xff]  ;;  %v257_v24 = vld [vmem:[#allocation2 + $0x170] sm:$0xff]  ;;  %v256_v26 = vld [vmem:[#allocation2 + $0x168] sm:$0xff] }
  0x26   : > { %615 = vmatpush1.msra.mxu1 %v431_v15  ;;  %539 = vmatprep.subr.mxu0 %v267_v16  ;;  %v417_v25 = vld [vmem:[#allocation2 + $0x670] sm:$0xff]  ;;  %v416_v27 = vld [vmem:[#allocation2 + $0x668] sm:$0xff]  ;;  %v251_v30 = vld [vmem:[#allocation2 + $0x140] sm:$0xff] }
  0x27   : > { %616 = vmatprep.subr.mxu1 %v427_v17  ;;  %540 = vmatpush1.msra.mxu0 %v266_v18  ;;  %v252_v28 = vld [vmem:[#allocation2 + $0x148] sm:$0xff]  ;;  %v411_v31 = vld [vmem:[#allocation2 + $0x640] sm:$0xff]  ;;  %v246_v34 = vld [vmem:[#allocation2 + $0x118] sm:$0xff] }
  0x28   : > { %617 = vmatpush1.msra.mxu1 %v426_v19  ;;  %541 = vmatprep.subr.mxu0 %v262_v20  ;;  %v412_v29 = vld [vmem:[#allocation2 + $0x648] sm:$0xff]  ;;  %v247_v32 = vld [vmem:[#allocation2 + $0x120] sm:$0xff]  ;;  %v406_v35 = vld [vmem:[#allocation2 + $0x618] sm:$0xff] }
  0x29   : > { %618 = vmatprep.subr.mxu1 %v422_v21  ;;  %542 = vmatpush1.msra.mxu0 %v261_v22  ;;  %v407_v33 = vld [vmem:[#allocation2 + $0x620] sm:$0xff]  ;;  %v242_v36 = vld [vmem:[#allocation2 + $0xf8] sm:$0xff]  ;;  %v241_v38 = vld [vmem:[#allocation2 + $0xf0] sm:$0xff] }
  0x2a   : > { %619 = vmatpush1.msra.mxu1 %v421_v23  ;;  %543 = vmatprep.subr.mxu0 %v257_v24  ;;  %v402_v37 = vld [vmem:[#allocation2 + $0x5f8] sm:$0xff]  ;;  %v401_v39 = vld [vmem:[#allocation2 + $0x5f0] sm:$0xff]  ;;  %v236_v42 = vld [vmem:[#allocation2 + $0xc8] sm:$0xff] }
  0x2b   : > { %620 = vmatprep.subr.mxu1 %v417_v25  ;;  %544 = vmatpush1.msra.mxu0 %v256_v26  ;;  %v237_v40 = vld [vmem:[#allocation2 + $0xd0] sm:$0xff]  ;;  %v396_v43 = vld [vmem:[#allocation2 + $0x5c8] sm:$0xff]  ;;  %v231_v46 = vld [vmem:[#allocation2 + $0xa0] sm:$0xff] }
  0x2c   : > { %621 = vmatpush1.msra.mxu1 %v416_v27  ;;  %545 = vmatprep.subr.mxu0 %v252_v28  ;;  %v397_v41 = vld [vmem:[#allocation2 + $0x5d0] sm:$0xff]  ;;  %v232_v44 = vld [vmem:[#allocation2 + $0xa8] sm:$0xff]  ;;  %v391_v47 = vld [vmem:[#allocation2 + $0x5a0] sm:$0xff] }
  0x2d   : > { %622 = vmatprep.subr.mxu1 %v412_v29  ;;  %546 = vmatpush1.msra.mxu0 %v251_v30  ;;  %v392_v45 = vld [vmem:[#allocation2 + $0x5a8] sm:$0xff]  ;;  %v227_v48 = vld [vmem:[#allocation2 + $0x80] sm:$0xff]  ;;  %v226_v50 = vld [vmem:[#allocation2 + $0x78] sm:$0xff] }
  0x2e   : > { %623 = vmatpush1.msra.mxu1 %v411_v31  ;;  %547 = vmatprep.subr.mxu0 %v247_v32  ;;  %v387_v49 = vld [vmem:[#allocation2 + $0x580] sm:$0xff]  ;;  %v386_v51 = vld [vmem:[#allocation2 + $0x578] sm:$0xff]  ;;  %v221_v54 = vld [vmem:[#allocation2 + $0x50] sm:$0xff] }
  0x2f   : > { %624 = vmatprep.subr.mxu1 %v407_v33  ;;  %548 = vmatpush1.msra.mxu0 %v246_v34  ;;  %v222_v52 = vld [vmem:[#allocation2 + $0x58] sm:$0xff]  ;;  %v381_v55 = vld [vmem:[#allocation2 + $0x550] sm:$0xff]  ;;  %v216_v58 = vld [vmem:[#allocation2 + $0x28] sm:$0xff] }
  0x30   : > { %625 = vmatpush1.msra.mxu1 %v406_v35  ;;  %549 = vmatprep.subr.mxu0 %v242_v36  ;;  %v382_v53 = vld [vmem:[#allocation2 + $0x558] sm:$0xff]  ;;  %v217_v56 = vld [vmem:[#allocation2 + $0x30] sm:$0xff]  ;;  %v376_v59 = vld [vmem:[#allocation2 + $0x528] sm:$0xff] }
  0x31   : > { %626 = vmatprep.subr.mxu1 %v402_v37  ;;  %550 = vmatpush1.msra.mxu0 %v241_v38  ;;  %v377_v57 = vld [vmem:[#allocation2 + $0x530] sm:$0xff]  ;;  %v212_v60 = vld [vmem:[#allocation2 + $0x8] sm:$0xff]  ;;  %v211_v62 = vld [vmem:[#allocation2] sm:$0xff] }
  0x32   : > { %627 = vmatpush1.msra.mxu1 %v401_v39  ;;  %551 = vmatprep.subr.mxu0 %v237_v40  ;;  %v372_v61 = vld [vmem:[#allocation2 + $0x508] sm:$0xff]  ;;  %v371_v63 = vld [vmem:[#allocation2 + $0x500] sm:$0xff]  ;;  %v366_v2 = vld [vmem:[#allocation2 + $0x4d8] sm:$0xff] }
  0x33   : > { %628 = vmatprep.subr.mxu1 %v397_v41  ;;  %552 = vmatpush1.msra.mxu0 %v236_v42  ;;  %v367_v0 = vld [vmem:[#allocation2 + $0x4e0] sm:$0xff]  ;;  %v526_v3 = vld [vmem:[#allocation2 + $0x9d8] sm:$0xff]  ;;  %v361_v6 = vld [vmem:[#allocation2 + $0x4b0] sm:$0xff] }
  0x34   : > { %629 = vmatpush1.msra.mxu1 %v396_v43  ;;  %553 = vmatprep.subr.mxu0 %v232_v44  ;;  %v527_v1 = vld [vmem:[#allocation2 + $0x9e0] sm:$0xff]  ;;  %v362_v4 = vld [vmem:[#allocation2 + $0x4b8] sm:$0xff]  ;;  %v521_v7 = vld [vmem:[#allocation2 + $0x9b0] sm:$0xff] }
  0x35   : > { %630 = vmatprep.subr.mxu1 %v392_v45  ;;  %554 = vmatpush1.msra.mxu0 %v231_v46  ;;  %v522_v5 = vld [vmem:[#allocation2 + $0x9b8] sm:$0xff]  ;;  %v357_v8 = vld [vmem:[#allocation2 + $0x490] sm:$0xff]  ;;  %v356_v10 = vld [vmem:[#allocation2 + $0x488] sm:$0xff] }
  0x36   : > { %631 = vmatpush1.msra.mxu1 %v391_v47  ;;  %555 = vmatprep.subr.mxu0 %v227_v48  ;;  %v517_v9 = vld [vmem:[#allocation2 + $0x990] sm:$0xff]  ;;  %v516_v11 = vld [vmem:[#allocation2 + $0x988] sm:$0xff]  ;;  %v351_v14 = vld [vmem:[#allocation2 + $0x460] sm:$0xff] }
  0x37   : > { %632 = vmatprep.subr.mxu1 %v387_v49  ;;  %556 = vmatpush1.msra.mxu0 %v226_v50  ;;  %v352_v12 = vld [vmem:[#allocation2 + $0x468] sm:$0xff]  ;;  %v511_v15 = vld [vmem:[#allocation2 + $0x960] sm:$0xff]  ;;  %v346_v18 = vld [vmem:[#allocation2 + $0x438] sm:$0xff] }
  0x38   : > { %633 = vmatpush1.msra.mxu1 %v386_v51  ;;  %557 = vmatprep.subr.mxu0 %v222_v52  ;;  %v512_v13 = vld [vmem:[#allocation2 + $0x968] sm:$0xff]  ;;  %v347_v16 = vld [vmem:[#allocation2 + $0x440] sm:$0xff]  ;;  %v506_v19 = vld [vmem:[#allocation2 + $0x938] sm:$0xff] }
  0x39   : > { %634 = vmatprep.subr.mxu1 %v382_v53  ;;  %558 = vmatpush1.msra.mxu0 %v221_v54  ;;  %v507_v17 = vld [vmem:[#allocation2 + $0x940] sm:$0xff]  ;;  %v342_v20 = vld [vmem:[#allocation2 + $0x418] sm:$0xff]  ;;  %v341_v22 = vld [vmem:[#allocation2 + $0x410] sm:$0xff] }
  0x3a   : > { %635 = vmatpush1.msra.mxu1 %v381_v55  ;;  %559 = vmatprep.subr.mxu0 %v217_v56  ;;  %v502_v21 = vld [vmem:[#allocation2 + $0x918] sm:$0xff]  ;;  %v501_v23 = vld [vmem:[#allocation2 + $0x910] sm:$0xff]  ;;  %v336_v26 = vld [vmem:[#allocation2 + $0x3e8] sm:$0xff] }
  0x3b   : > { %636 = vmatprep.subr.mxu1 %v377_v57  ;;  %560 = vmatpush1.msra.mxu0 %v216_v58  ;;  %v337_v24 = vld [vmem:[#allocation2 + $0x3f0] sm:$0xff]  ;;  %v496_v27 = vld [vmem:[#allocation2 + $0x8e8] sm:$0xff]  ;;  %v331_v30 = vld [vmem:[#allocation2 + $0x3c0] sm:$0xff] }
  0x3c   : > { %637 = vmatpush1.msra.mxu1 %v376_v59  ;;  %561 = vmatprep.subr.mxu0 %v212_v60  ;;  %v497_v25 = vld [vmem:[#allocation2 + $0x8f0] sm:$0xff]  ;;  %v332_v28 = vld [vmem:[#allocation2 + $0x3c8] sm:$0xff]  ;;  %v491_v31 = vld [vmem:[#allocation2 + $0x8c0] sm:$0xff] }
  0x3d   : > { %638 = vmatprep.subr.mxu1 %v372_v61  ;;  %562 = vmatpush1.msra.mxu0 %v211_v62  ;;  %v492_v29 = vld [vmem:[#allocation2 + $0x8c8] sm:$0xff]  ;;  %v327_v32 = vld [vmem:[#allocation2 + $0x3a0] sm:$0xff]  ;;  %v326_v34 = vld [vmem:[#allocation2 + $0x398] sm:$0xff] }
  0x3e   : > { %639 = vmatpush1.msra.mxu1 %v371_v63  ;;  %563 = vmatprep.subr.mxu0 %v367_v0  ;;  %v487_v33 = vld [vmem:[#allocation2 + $0x8a0] sm:$0xff]  ;;  %v486_v35 = vld [vmem:[#allocation2 + $0x898] sm:$0xff]  ;;  %v321_v38 = vld [vmem:[#allocation2 + $0x370] sm:$0xff] }
  0x3f   : > { %640 = vmatprep.subr.mxu1 %v527_v1  ;;  %564 = vmatpush2.msra.mxu0 %v366_v2  ;;  %v322_v36 = vld [vmem:[#allocation2 + $0x378] sm:$0xff]  ;;  %v481_v39 = vld [vmem:[#allocation2 + $0x870] sm:$0xff]  ;;  %v316_v42 = vld [vmem:[#allocation2 + $0x348] sm:$0xff] }
  0x40   : > { %641 = vmatpush2.msra.mxu1 %v526_v3  ;;  %565 = vmatprep.subr.mxu0 %v362_v4  ;;  %v482_v37 = vld [vmem:[#allocation2 + $0x878] sm:$0xff]  ;;  %v317_v40 = vld [vmem:[#allocation2 + $0x350] sm:$0xff]  ;;  %v476_v43 = vld [vmem:[#allocation2 + $0x848] sm:$0xff] }
  0x41   : > { %642 = vmatprep.subr.mxu1 %v522_v5  ;;  %566 = vmatpush2.msra.mxu0 %v361_v6  ;;  %v477_v41 = vld [vmem:[#allocation2 + $0x850] sm:$0xff]  ;;  %v312_v44 = vld [vmem:[#allocation2 + $0x328] sm:$0xff]  ;;  %v311_v46 = vld [vmem:[#allocation2 + $0x320] sm:$0xff] }
  0x42   : > { %643 = vmatpush2.msra.mxu1 %v521_v7  ;;  %567 = vmatprep.subr.mxu0 %v357_v8  ;;  %v472_v45 = vld [vmem:[#allocation2 + $0x828] sm:$0xff]  ;;  %v471_v47 = vld [vmem:[#allocation2 + $0x820] sm:$0xff]  ;;  %v306_v50 = vld [vmem:[#allocation2 + $0x2f8] sm:$0xff] }
  0x43   : > { %644 = vmatprep.subr.mxu1 %v517_v9  ;;  %568 = vmatpush2.msra.mxu0 %v356_v10  ;;  %v307_v48 = vld [vmem:[#allocation2 + $0x300] sm:$0xff]  ;;  %v466_v51 = vld [vmem:[#allocation2 + $0x7f8] sm:$0xff]  ;;  %v301_v54 = vld [vmem:[#allocation2 + $0x2d0] sm:$0xff] }
  0x44   : > { %645 = vmatpush2.msra.mxu1 %v516_v11  ;;  %569 = vmatprep.subr.mxu0 %v352_v12  ;;  %v467_v49 = vld [vmem:[#allocation2 + $0x800] sm:$0xff]  ;;  %v302_v52 = vld [vmem:[#allocation2 + $0x2d8] sm:$0xff]  ;;  %v461_v55 = vld [vmem:[#allocation2 + $0x7d0] sm:$0xff] }
  0x45   : > { %646 = vmatprep.subr.mxu1 %v512_v13  ;;  %570 = vmatpush2.msra.mxu0 %v351_v14  ;;  %v462_v53 = vld [vmem:[#allocation2 + $0x7d8] sm:$0xff]  ;;  %v297_v56 = vld [vmem:[#allocation2 + $0x2b0] sm:$0xff]  ;;  %v296_v58 = vld [vmem:[#allocation2 + $0x2a8] sm:$0xff] }
  0x46   : > { %647 = vmatpush2.msra.mxu1 %v511_v15  ;;  %571 = vmatprep.subr.mxu0 %v347_v16  ;;  %v457_v57 = vld [vmem:[#allocation2 + $0x7b0] sm:$0xff]  ;;  %v456_v59 = vld [vmem:[#allocation2 + $0x7a8] sm:$0xff]  ;;  %v291_v62 = vld [vmem:[#allocation2 + $0x280] sm:$0xff] }
  0x47   : > { %648 = vmatprep.subr.mxu1 %v507_v17  ;;  %572 = vmatpush2.msra.mxu0 %v346_v18  ;;  %v292_v60 = vld [vmem:[#allocation2 + $0x288] sm:$0xff]  ;;  %v451_v0 = vld [vmem:[#allocation2 + $0x780] sm:$0xff]  ;;  %v1514_v1 = vld [vmem:[%s1508_s26 + $0x18] sm:$0xff] }
  0x48   : > { %649 = vmatpush2.msra.mxu1 %v506_v19  ;;  %573 = vmatprep.subr.mxu0 %v342_v20  ;;  %v452_v61 = vld [vmem:[#allocation2 + $0x788] sm:$0xff]  ;;  %v1517_v2 = vld [vmem:[%s1508_s26] sm:$0xff]  ;;  %v1520_v3 = vld [vmem:[%s1508_s26 + $0x10] sm:$0xff] }
  0x49   : > { %650 = vmatprep.subr.mxu1 %v502_v21  ;;  %574 = vmatpush2.msra.mxu0 %v341_v22  ;;  %v1511_v63 = vld [vmem:[%s1508_s26 + $0x8] sm:$0xff]  ;;  %v289_v4 = vld [vmem:[#allocation2 + $0x270] sm:$0xff]  ;;  %v283_v10 = vld [vmem:[#allocation2 + $0x240] sm:$0xff] }
  0x4a   : > { %651 = vmatpush2.msra.mxu1 %v501_v23  ;;  %575 = vmatprep.subr.mxu0 %v337_v24  ;;  %v449_v5 = vld [vmem:[#allocation2 + $0x770] sm:$0xff]  ;;  %v288_v6 = vld [vmem:[#allocation2 + $0x268] sm:$0xff]  ;;  %v443_v11 = vld [vmem:[#allocation2 + $0x740] sm:$0xff] }
  0x4b   : > { %652 = vmatprep.subr.mxu1 %v497_v25  ;;  %576 = vmatpush2.msra.mxu0 %v336_v26  ;;  %v448_v7 = vld [vmem:[#allocation2 + $0x768] sm:$0xff]  ;;  %v279_v12 = vld [vmem:[#allocation2 + $0x220] sm:$0xff]  ;;  %v278_v14 = vld [vmem:[#allocation2 + $0x218] sm:$0xff] }
  0x4c   : > { %653 = vmatpush2.msra.mxu1 %v496_v27  ;;  %577 = vmatprep.subr.mxu0 %v332_v28  ;;  %v284_v8 = vld [vmem:[#allocation2 + $0x248] sm:$0xff]  ;;  %v439_v13 = vld [vmem:[#allocation2 + $0x720] sm:$0xff]  ;;  %v438_v15 = vld [vmem:[#allocation2 + $0x718] sm:$0xff] }
  0x4d   : > { %654 = vmatprep.subr.mxu1 %v492_v29  ;;  %578 = vmatpush2.msra.mxu0 %v331_v30  ;;  %v444_v9 = vld [vmem:[#allocation2 + $0x748] sm:$0xff]  ;;  %v274_v16 = vld [vmem:[#allocation2 + $0x1f8] sm:$0xff]  ;;  %v273_v18 = vld [vmem:[#allocation2 + $0x1f0] sm:$0xff] }
  0x4e   : > { %655 = vmatpush2.msra.mxu1 %v491_v31  ;;  %579 = vmatprep.subr.mxu0 %v327_v32  ;;  %v434_v17 = vld [vmem:[#allocation2 + $0x6f8] sm:$0xff]  ;;  %v433_v19 = vld [vmem:[#allocation2 + $0x6f0] sm:$0xff]  ;;  %v268_v22 = vld [vmem:[#allocation2 + $0x1c8] sm:$0xff] }
  0x4f   : > { %656 = vmatprep.subr.mxu1 %v487_v33  ;;  %580 = vmatpush2.msra.mxu0 %v326_v34  ;;  %v269_v20 = vld [vmem:[#allocation2 + $0x1d0] sm:$0xff]  ;;  %v428_v23 = vld [vmem:[#allocation2 + $0x6c8] sm:$0xff]  ;;  %v263_v26 = vld [vmem:[#allocation2 + $0x1a0] sm:$0xff] }
  0x50   : > { %657 = vmatpush2.msra.mxu1 %v486_v35  ;;  %581 = vmatprep.subr.mxu0 %v322_v36  ;;  %v429_v21 = vld [vmem:[#allocation2 + $0x6d0] sm:$0xff]  ;;  %v264_v24 = vld [vmem:[#allocation2 + $0x1a8] sm:$0xff]  ;;  %v423_v27 = vld [vmem:[#allocation2 + $0x6a0] sm:$0xff] }
  0x51   : > { %658 = vmatprep.subr.mxu1 %v482_v37  ;;  %582 = vmatpush2.msra.mxu0 %v321_v38  ;;  %v424_v25 = vld [vmem:[#allocation2 + $0x6a8] sm:$0xff]  ;;  %v259_v28 = vld [vmem:[#allocation2 + $0x180] sm:$0xff]  ;;  %v258_v30 = vld [vmem:[#allocation2 + $0x178] sm:$0xff] }
  0x52   : > { %659 = vmatpush2.msra.mxu1 %v481_v39  ;;  %583 = vmatprep.subr.mxu0 %v317_v40  ;;  %v419_v29 = vld [vmem:[#allocation2 + $0x680] sm:$0xff]  ;;  %v418_v31 = vld [vmem:[#allocation2 + $0x678] sm:$0xff]  ;;  %v253_v34 = vld [vmem:[#allocation2 + $0x150] sm:$0xff] }
  0x53   : > { %660 = vmatprep.subr.mxu1 %v477_v41  ;;  %584 = vmatpush2.msra.mxu0 %v316_v42  ;;  %v254_v32 = vld [vmem:[#allocation2 + $0x158] sm:$0xff]  ;;  %v413_v35 = vld [vmem:[#allocation2 + $0x650] sm:$0xff]  ;;  %v248_v38 = vld [vmem:[#allocation2 + $0x128] sm:$0xff] }
  0x54   : > { %661 = vmatpush2.msra.mxu1 %v476_v43  ;;  %585 = vmatprep.subr.mxu0 %v312_v44  ;;  %v414_v33 = vld [vmem:[#allocation2 + $0x658] sm:$0xff]  ;;  %v249_v36 = vld [vmem:[#allocation2 + $0x130] sm:$0xff]  ;;  %v408_v39 = vld [vmem:[#allocation2 + $0x628] sm:$0xff] }
  0x55   : > { %662 = vmatprep.subr.mxu1 %v472_v45  ;;  %586 = vmatpush2.msra.mxu0 %v311_v46  ;;  %v409_v37 = vld [vmem:[#allocation2 + $0x630] sm:$0xff]  ;;  %v244_v40 = vld [vmem:[#allocation2 + $0x108] sm:$0xff]  ;;  %v243_v42 = vld [vmem:[#allocation2 + $0x100] sm:$0xff] }
  0x56   : > { %663 = vmatpush2.msra.mxu1 %v471_v47  ;;  %587 = vmatprep.subr.mxu0 %v307_v48  ;;  %v404_v41 = vld [vmem:[#allocation2 + $0x608] sm:$0xff]  ;;  %v403_v43 = vld [vmem:[#allocation2 + $0x600] sm:$0xff]  ;;  %v238_v46 = vld [vmem:[#allocation2 + $0xd8] sm:$0xff] }
  0x57   : > { %664 = vmatprep.subr.mxu1 %v467_v49  ;;  %588 = vmatpush2.msra.mxu0 %v306_v50  ;;  %v239_v44 = vld [vmem:[#allocation2 + $0xe0] sm:$0xff]  ;;  %v398_v47 = vld [vmem:[#allocation2 + $0x5d8] sm:$0xff]  ;;  %v233_v50 = vld [vmem:[#allocation2 + $0xb0] sm:$0xff] }
  0x58   : > { %665 = vmatpush2.msra.mxu1 %v466_v51  ;;  %589 = vmatprep.subr.mxu0 %v302_v52  ;;  %v399_v45 = vld [vmem:[#allocation2 + $0x5e0] sm:$0xff]  ;;  %v234_v48 = vld [vmem:[#allocation2 + $0xb8] sm:$0xff]  ;;  %v393_v51 = vld [vmem:[#allocation2 + $0x5b0] sm:$0xff] }
  0x59   : > { %666 = vmatprep.subr.mxu1 %v462_v53  ;;  %590 = vmatpush2.msra.mxu0 %v301_v54  ;;  %v394_v49 = vld [vmem:[#allocation2 + $0x5b8] sm:$0xff]  ;;  %v229_v52 = vld [vmem:[#allocation2 + $0x90] sm:$0xff]  ;;  %v228_v54 = vld [vmem:[#allocation2 + $0x88] sm:$0xff] }
  0x5a   : > { %667 = vmatpush2.msra.mxu1 %v461_v55  ;;  %591 = vmatprep.subr.mxu0 %v297_v56  ;;  %v389_v53 = vld [vmem:[#allocation2 + $0x590] sm:$0xff]  ;;  %v388_v55 = vld [vmem:[#allocation2 + $0x588] sm:$0xff] }
  0x5b   : > { %668 = vmatprep.subr.mxu1 %v457_v57  ;;  %592 = vmatpush2.msra.mxu0 %v296_v58  ;;  %v224_v56 = vld [vmem:[#allocation2 + $0x68] sm:$0xff]  ;;  %v223_v58 = vld [vmem:[#allocation2 + $0x60] sm:$0xff] }
  0x5c   : > { %669 = vmatpush2.msra.mxu1 %v456_v59  ;;  %593 = vmatprep.subr.mxu0 %v292_v60  ;;  %v384_v57 = vld [vmem:[#allocation2 + $0x568] sm:$0xff]  ;;  %v383_v59 = vld [vmem:[#allocation2 + $0x560] sm:$0xff] }
  0x5d   : > { %670 = vmatprep.subr.mxu1 %v452_v61  ;;  %594 = vmatpush2.msra.mxu0 %v291_v62  ;;  %v219_v60 = vld [vmem:[#allocation2 + $0x40] sm:$0xff]  ;;  %v218_v62 = vld [vmem:[#allocation2 + $0x38] sm:$0xff] }
  0x5e   : > { %595 = vmatprep.mubr.f32.mxu0 %v1511_v63  ;;  %671 = vmatpush2.msra.mxu1 %v451_v0  ;;  %v379_v61 = vld [vmem:[#allocation2 + $0x540] sm:$0xff]  ;;  %v378_v0 = vld [vmem:[#allocation2 + $0x538] sm:$0xff] }
  0x5f   : > { %672 = vmatprep.mubr.f32.mxu1 %v1514_v1  ;;  %596 = vmatmul.mubr.f32.vlgmr.msra.gmra.mxu0 %v1517_v2 }
  0x60   : > { %673 = vmatmul.mubr.f32.vlgmr.msra.gmra.mxu1 %v1520_v3  ;;  %685 = vmatprep.subr.mxu0 %v289_v4  ;;  %v214_v4 = vld [vmem:[#allocation2 + $0x18] sm:$0xff] }
  0x61   : > { %762 = vmatprep.subr.mxu1 %v449_v5  ;;  %686 = vmatpush1.msra.mxu0 %v288_v6  ;;  %v374_v5 = vld [vmem:[#allocation2 + $0x518] sm:$0xff]  ;;  %v213_v6 = vld [vmem:[#allocation2 + $0x10] sm:$0xff] }
  0x62   : > { %763 = vmatpush1.msra.mxu1 %v448_v7  ;;  %687 = vmatprep.subr.mxu0 %v284_v8  ;;  %v373_v7 = vld [vmem:[#allocation2 + $0x510] sm:$0xff] }
  0x63   : > { %764 = vmatprep.subr.mxu1 %v444_v9  ;;  %688 = vmatpush1.msra.mxu0 %v283_v10  ;;  %v369_v8 = vld [vmem:[#allocation2 + $0x4f0] sm:$0xff]  ;;  %v368_v10 = vld [vmem:[#allocation2 + $0x4e8] sm:$0xff] }
  0x64   : > { %765 = vmatpush1.msra.mxu1 %v443_v11  ;;  %689 = vmatprep.subr.mxu0 %v279_v12  ;;  %v529_v9 = vld [vmem:[#allocation2 + $0x9f0] sm:$0xff]  ;;  %v528_v11 = vld [vmem:[#allocation2 + $0x9e8] sm:$0xff] }
  0x65   : > { %766 = vmatprep.subr.mxu1 %v439_v13  ;;  %690 = vmatpush1.msra.mxu0 %v278_v14  ;;  %v364_v12 = vld [vmem:[#allocation2 + $0x4c8] sm:$0xff]  ;;  %v363_v14 = vld [vmem:[#allocation2 + $0x4c0] sm:$0xff] }
  0x66   : > { %767 = vmatpush1.msra.mxu1 %v438_v15  ;;  %691 = vmatprep.subr.mxu0 %v274_v16  ;;  %v524_v13 = vld [vmem:[#allocation2 + $0x9c8] sm:$0xff]  ;;  %v523_v15 = vld [vmem:[#allocation2 + $0x9c0] sm:$0xff] }
  0x67   : > { %768 = vmatprep.subr.mxu1 %v434_v17  ;;  %692 = vmatpush1.msra.mxu0 %v273_v18  ;;  %v359_v16 = vld [vmem:[#allocation2 + $0x4a0] sm:$0xff]  ;;  %v358_v18 = vld [vmem:[#allocation2 + $0x498] sm:$0xff] }
  0x68   : > { %769 = vmatpush1.msra.mxu1 %v433_v19  ;;  %693 = vmatprep.subr.mxu0 %v269_v20  ;;  %v519_v17 = vld [vmem:[#allocation2 + $0x9a0] sm:$0xff]  ;;  %v518_v19 = vld [vmem:[#allocation2 + $0x998] sm:$0xff] }
  0x69   : > { %770 = vmatprep.subr.mxu1 %v429_v21  ;;  %694 = vmatpush1.msra.mxu0 %v268_v22  ;;  %v354_v20 = vld [vmem:[#allocation2 + $0x478] sm:$0xff]  ;;  %v353_v22 = vld [vmem:[#allocation2 + $0x470] sm:$0xff] }
  0x6a   : > { %771 = vmatpush1.msra.mxu1 %v428_v23  ;;  %695 = vmatprep.subr.mxu0 %v264_v24  ;;  %v514_v21 = vld [vmem:[#allocation2 + $0x978] sm:$0xff]  ;;  %v513_v23 = vld [vmem:[#allocation2 + $0x970] sm:$0xff] }
  0x6b   : > { %772 = vmatprep.subr.mxu1 %v424_v25  ;;  %696 = vmatpush1.msra.mxu0 %v263_v26  ;;  %v349_v24 = vld [vmem:[#allocation2 + $0x450] sm:$0xff]  ;;  %v348_v26 = vld [vmem:[#allocation2 + $0x448] sm:$0xff] }
  0x6c   : > { %773 = vmatpush1.msra.mxu1 %v423_v27  ;;  %697 = vmatprep.subr.mxu0 %v259_v28  ;;  %v509_v25 = vld [vmem:[#allocation2 + $0x950] sm:$0xff]  ;;  %v508_v27 = vld [vmem:[#allocation2 + $0x948] sm:$0xff] }
  0x6d   : > { %774 = vmatprep.subr.mxu1 %v419_v29  ;;  %698 = vmatpush1.msra.mxu0 %v258_v30  ;;  %v344_v28 = vld [vmem:[#allocation2 + $0x428] sm:$0xff]  ;;  %v343_v30 = vld [vmem:[#allocation2 + $0x420] sm:$0xff] }
  0x6e   : > { %775 = vmatpush1.msra.mxu1 %v418_v31  ;;  %699 = vmatprep.subr.mxu0 %v254_v32  ;;  %v504_v29 = vld [vmem:[#allocation2 + $0x928] sm:$0xff]  ;;  %v503_v31 = vld [vmem:[#allocation2 + $0x920] sm:$0xff] }
  0x6f   : > { %776 = vmatprep.subr.mxu1 %v414_v33  ;;  %700 = vmatpush1.msra.mxu0 %v253_v34  ;;  %v339_v32 = vld [vmem:[#allocation2 + $0x400] sm:$0xff]  ;;  %v338_v34 = vld [vmem:[#allocation2 + $0x3f8] sm:$0xff] }
  0x70   : > { %777 = vmatpush1.msra.mxu1 %v413_v35  ;;  %701 = vmatprep.subr.mxu0 %v249_v36  ;;  %v499_v33 = vld [vmem:[#allocation2 + $0x900] sm:$0xff]  ;;  %v498_v35 = vld [vmem:[#allocation2 + $0x8f8] sm:$0xff] }
  0x71   : > { %778 = vmatprep.subr.mxu1 %v409_v37  ;;  %702 = vmatpush1.msra.mxu0 %v248_v38  ;;  %v334_v36 = vld [vmem:[#allocation2 + $0x3d8] sm:$0xff]  ;;  %v333_v38 = vld [vmem:[#allocation2 + $0x3d0] sm:$0xff] }
  0x72   : > { %779 = vmatpush1.msra.mxu1 %v408_v39  ;;  %703 = vmatprep.subr.mxu0 %v244_v40  ;;  %v494_v37 = vld [vmem:[#allocation2 + $0x8d8] sm:$0xff]  ;;  %v493_v39 = vld [vmem:[#allocation2 + $0x8d0] sm:$0xff] }
  0x73   : > { %780 = vmatprep.subr.mxu1 %v404_v41  ;;  %704 = vmatpush1.msra.mxu0 %v243_v42  ;;  %v329_v40 = vld [vmem:[#allocation2 + $0x3b0] sm:$0xff]  ;;  %v328_v42 = vld [vmem:[#allocation2 + $0x3a8] sm:$0xff] }
  0x74   : > { %781 = vmatpush1.msra.mxu1 %v403_v43  ;;  %705 = vmatprep.subr.mxu0 %v239_v44  ;;  %v489_v41 = vld [vmem:[#allocation2 + $0x8b0] sm:$0xff]  ;;  %v488_v43 = vld [vmem:[#allocation2 + $0x8a8] sm:$0xff] }
  0x75   : > { %782 = vmatprep.subr.mxu1 %v399_v45  ;;  %706 = vmatpush1.msra.mxu0 %v238_v46  ;;  %v324_v44 = vld [vmem:[#allocation2 + $0x388] sm:$0xff]  ;;  %v323_v46 = vld [vmem:[#allocation2 + $0x380] sm:$0xff] }
  0x76   : > { %783 = vmatpush1.msra.mxu1 %v398_v47  ;;  %707 = vmatprep.subr.mxu0 %v234_v48  ;;  %v484_v45 = vld [vmem:[#allocation2 + $0x888] sm:$0xff]  ;;  %v483_v47 = vld [vmem:[#allocation2 + $0x880] sm:$0xff] }
  0x77   : > { %784 = vmatprep.subr.mxu1 %v394_v49  ;;  %708 = vmatpush1.msra.mxu0 %v233_v50  ;;  %v319_v48 = vld [vmem:[#allocation2 + $0x360] sm:$0xff]  ;;  %v318_v50 = vld [vmem:[#allocation2 + $0x358] sm:$0xff] }
  0x78   : > { %785 = vmatpush1.msra.mxu1 %v393_v51  ;;  %709 = vmatprep.subr.mxu0 %v229_v52  ;;  %v479_v49 = vld [vmem:[#allocation2 + $0x860] sm:$0xff]  ;;  %v478_v51 = vld [vmem:[#allocation2 + $0x858] sm:$0xff] }
  0x79   : > { %786 = vmatprep.subr.mxu1 %v389_v53  ;;  %710 = vmatpush1.msra.mxu0 %v228_v54  ;;  %v314_v52 = vld [vmem:[#allocation2 + $0x338] sm:$0xff]  ;;  %v313_v54 = vld [vmem:[#allocation2 + $0x330] sm:$0xff] }
  0x7a   : > { %787 = vmatpush1.msra.mxu1 %v388_v55  ;;  %711 = vmatprep.subr.mxu0 %v224_v56  ;;  %v474_v53 = vld [vmem:[#allocation2 + $0x838] sm:$0xff]  ;;  %v473_v55 = vld [vmem:[#allocation2 + $0x830] sm:$0xff] }
  0x7b   : > { %788 = vmatprep.subr.mxu1 %v384_v57  ;;  %712 = vmatpush1.msra.mxu0 %v223_v58  ;;  %v309_v56 = vld [vmem:[#allocation2 + $0x310] sm:$0xff]  ;;  %v1527_v58 = vld [vmem:[%s1508_s26 + $0x28] sm:$0x1] }
  0x7c   : > { %789 = vmatpush1.msra.mxu1 %v383_v59  ;;  %713 = vmatprep.subr.mxu0 %v219_v60  ;;  %v469_v57 = vld [vmem:[#allocation2 + $0x810] sm:$0xff]  ;;  %v1530_v59 = vld [vmem:[%s1508_s26 + $0x38] sm:$0x1]  ;;  %v308_v60 = vld [vmem:[#allocation2 + $0x308] sm:$0xff] }
  0x7d   : > { %790 = vmatprep.subr.mxu1 %v379_v61  ;;  %714 = vmatpush1.msra.mxu0 %v218_v62  ;;  %v468_v61 = vld [vmem:[#allocation2 + $0x808] sm:$0xff]  ;;  %v1533_v62 = vld [vmem:[%s1508_s26 + $0x20] sm:$0x1] }
  0x7e   : > { %791 = vmatpush1.msra.mxu1 %v378_v0  ;;  %715 = vmatprep.subr.mxu0 %v214_v4  ;;  %v1536_v0 = vld [vmem:[%s1508_s26 + $0x30] sm:$0x1]  ;;  %v304_v4 = vld [vmem:[#allocation2 + $0x2e8] sm:$0xff] }
  0x7f   : > { %792 = vmatprep.subr.mxu1 %v374_v5  ;;  %716 = vmatpush1.msra.mxu0 %v213_v6  ;;  %v464_v5 = vld [vmem:[#allocation2 + $0x7e8] sm:$0xff]  ;;  %v303_v6 = vld [vmem:[#allocation2 + $0x2e0] sm:$0xff] }
  0x80   : > { %793 = vmatpush1.msra.mxu1 %v373_v7  ;;  %717 = vmatprep.subr.mxu0 %v369_v8  ;;  %v463_v7 = vld [vmem:[#allocation2 + $0x7e0] sm:$0xff] }
  0x81   : > { %794 = vmatprep.subr.mxu1 %v529_v9  ;;  %718 = vmatpush2.msra.mxu0 %v368_v10  ;;  %v299_v8 = vld [vmem:[#allocation2 + $0x2c0] sm:$0xff]  ;;  %v298_v10 = vld [vmem:[#allocation2 + $0x2b8] sm:$0xff] }
  0x82   : > { %795 = vmatpush2.msra.mxu1 %v528_v11  ;;  %719 = vmatprep.subr.mxu0 %v364_v12  ;;  %v459_v9 = vld [vmem:[#allocation2 + $0x7c0] sm:$0xff]  ;;  %v458_v11 = vld [vmem:[#allocation2 + $0x7b8] sm:$0xff] }
  0x83   : > { %796 = vmatprep.subr.mxu1 %v524_v13  ;;  %720 = vmatpush2.msra.mxu0 %v363_v14  ;;  %v294_v12 = vld [vmem:[#allocation2 + $0x298] sm:$0xff]  ;;  %v293_v14 = vld [vmem:[#allocation2 + $0x290] sm:$0xff] }
  0x84   : > { %797 = vmatpush2.msra.mxu1 %v523_v15  ;;  %721 = vmatprep.subr.mxu0 %v359_v16  ;;  %v454_v13 = vld [vmem:[#allocation2 + $0x798] sm:$0xff]  ;;  %v453_v15 = vld [vmem:[#allocation2 + $0x790] sm:$0xff] }
  0x85   : > { %798 = vmatprep.subr.mxu1 %v519_v17  ;;  %722 = vmatpush2.msra.mxu0 %v358_v18  ;;  %v370_v16 = vld [vmem:[#allocation2 + $0x4f8] sm:$0xff] }
  0x86   : > { %799 = vmatpush2.msra.mxu1 %v518_v19  ;;  %723 = vmatprep.subr.mxu0 %v354_v20  ;;  %v530_v17 = vld [vmem:[#allocation2 + $0x9f8] sm:$0xff]  ;;  %v365_v20 = vld [vmem:[#allocation2 + $0x4d0] sm:$0xff] }
  0x87   : > { %800 = vmatprep.subr.mxu1 %v514_v21  ;;  %724 = vmatpush2.msra.mxu0 %v353_v22  ;;  %v290_v18 = vld [vmem:[#allocation2 + $0x278] sm:$0xff]  ;;  %v525_v21 = vld [vmem:[#allocation2 + $0x9d0] sm:$0xff] }
  0x88   : > { %801 = vmatpush2.msra.mxu1 %v513_v23  ;;  %725 = vmatprep.subr.mxu0 %v349_v24  ;;  %v450_v19 = vld [vmem:[#allocation2 + $0x778] sm:$0xff]  ;;  %v285_v22 = vld [vmem:[#allocation2 + $0x250] sm:$0xff]  ;;  %v360_v24 = vld [vmem:[#allocation2 + $0x4a8] sm:$0xff] }
  0x89   : > { %802 = vmatprep.subr.mxu1 %v509_v25  ;;  %726 = vmatpush2.msra.mxu0 %v348_v26  ;;  %v445_v23 = vld [vmem:[#allocation2 + $0x750] sm:$0xff]  ;;  %v520_v25 = vld [vmem:[#allocation2 + $0x9a8] sm:$0xff] }
  0x8a   : > { %803 = vmatpush2.msra.mxu1 %v508_v27  ;;  %727 = vmatprep.subr.mxu0 %v344_v28  ;;  %v280_v26 = vld [vmem:[#allocation2 + $0x228] sm:$0xff]  ;;  %v355_v28 = vld [vmem:[#allocation2 + $0x480] sm:$0xff] }
  0x8b   : > { %804 = vmatprep.subr.mxu1 %v504_v29  ;;  %728 = vmatpush2.msra.mxu0 %v343_v30  ;;  %v440_v27 = vld [vmem:[#allocation2 + $0x728] sm:$0xff]  ;;  %v515_v29 = vld [vmem:[#allocation2 + $0x980] sm:$0xff] }
  0x8c   : > { %805 = vmatpush2.msra.mxu1 %v503_v31  ;;  %729 = vmatprep.subr.mxu0 %v339_v32  ;;  %v275_v30 = vld [vmem:[#allocation2 + $0x200] sm:$0xff]  ;;  %v350_v32 = vld [vmem:[#allocation2 + $0x458] sm:$0xff] }
  0x8d   : > { %806 = vmatprep.subr.mxu1 %v499_v33  ;;  %730 = vmatpush2.msra.mxu0 %v338_v34  ;;  %v435_v31 = vld [vmem:[#allocation2 + $0x700] sm:$0xff]  ;;  %v510_v33 = vld [vmem:[#allocation2 + $0x958] sm:$0xff] }
  0x8e   : > { %807 = vmatpush2.msra.mxu1 %v498_v35  ;;  %731 = vmatprep.subr.mxu0 %v334_v36  ;;  %v270_v34 = vld [vmem:[#allocation2 + $0x1d8] sm:$0xff]  ;;  %v345_v36 = vld [vmem:[#allocation2 + $0x430] sm:$0xff] }
  0x8f   : > { %808 = vmatprep.subr.mxu1 %v494_v37  ;;  %732 = vmatpush2.msra.mxu0 %v333_v38  ;;  %v430_v35 = vld [vmem:[#allocation2 + $0x6d8] sm:$0xff]  ;;  %v505_v37 = vld [vmem:[#allocation2 + $0x930] sm:$0xff] }
  0x90   : > { %809 = vmatpush2.msra.mxu1 %v493_v39  ;;  %733 = vmatprep.subr.mxu0 %v329_v40  ;;  %v265_v38 = vld [vmem:[#allocation2 + $0x1b0] sm:$0xff]  ;;  %v340_v40 = vld [vmem:[#allocation2 + $0x408] sm:$0xff] }
  0x91   : > { %810 = vmatprep.subr.mxu1 %v489_v41  ;;  %734 = vmatpush2.msra.mxu0 %v328_v42  ;;  %v425_v39 = vld [vmem:[#allocation2 + $0x6b0] sm:$0xff]  ;;  %v500_v41 = vld [vmem:[#allocation2 + $0x908] sm:$0xff] }
  0x92   : > { %811 = vmatpush2.msra.mxu1 %v488_v43  ;;  %735 = vmatprep.subr.mxu0 %v324_v44  ;;  %v260_v42 = vld [vmem:[#allocation2 + $0x188] sm:$0xff]  ;;  %v335_v44 = vld [vmem:[#allocation2 + $0x3e0] sm:$0xff] }
  0x93   : > { %812 = vmatprep.subr.mxu1 %v484_v45  ;;  %736 = vmatpush2.msra.mxu0 %v323_v46  ;;  %v420_v43 = vld [vmem:[#allocation2 + $0x688] sm:$0xff]  ;;  %v495_v45 = vld [vmem:[#allocation2 + $0x8e0] sm:$0xff] }
  0x94   : > { %813 = vmatpush2.msra.mxu1 %v483_v47  ;;  %737 = vmatprep.subr.mxu0 %v319_v48  ;;  %v255_v46 = vld [vmem:[#allocation2 + $0x160] sm:$0xff]  ;;  %v330_v48 = vld [vmem:[#allocation2 + $0x3b8] sm:$0xff] }
  0x95   : > { %814 = vmatprep.subr.mxu1 %v479_v49  ;;  %738 = vmatpush2.msra.mxu0 %v318_v50  ;;  %v415_v47 = vld [vmem:[#allocation2 + $0x660] sm:$0xff]  ;;  %v490_v49 = vld [vmem:[#allocation2 + $0x8b8] sm:$0xff] }
  0x96   : > { %815 = vmatpush2.msra.mxu1 %v478_v51  ;;  %739 = vmatprep.subr.mxu0 %v314_v52  ;;  %v250_v50 = vld [vmem:[#allocation2 + $0x138] sm:$0xff]  ;;  %v325_v52 = vld [vmem:[#allocation2 + $0x390] sm:$0xff] }
  0x97   : > { %816 = vmatprep.subr.mxu1 %v474_v53  ;;  %740 = vmatpush2.msra.mxu0 %v313_v54  ;;  %v410_v51 = vld [vmem:[#allocation2 + $0x638] sm:$0xff]  ;;  %v485_v53 = vld [vmem:[#allocation2 + $0x890] sm:$0xff] }
  0x98   : > { %817 = vmatpush2.msra.mxu1 %v473_v55  ;;  %741 = vmatprep.subr.mxu0 %v309_v56  ;;  %v245_v54 = vld [vmem:[#allocation2 + $0x110] sm:$0xff]  ;;  %v320_v56 = vld [vmem:[#allocation2 + $0x368] sm:$0xff] }
  0x99   : > { %818 = vmatprep.subr.mxu1 %v469_v57  ;;  %601 = vmatprep.mubr.f32.mxu0 %v1527_v58  ;;  %v405_v55 = vld [vmem:[#allocation2 + $0x610] sm:$0xff]  ;;  %v480_v57 = vld [vmem:[#allocation2 + $0x868] sm:$0xff] }
  0x9a   : > { %678 = vmatprep.mubr.f32.mxu1 %v1530_v59  ;;  %742 = vmatpush2.msra.mxu0 %v308_v60  ;;  %v240_v60 = vld [vmem:[#allocation2 + $0xe8] sm:$0xff] }
  0x9b   : > { %819 = vmatpush2.msra.mxu1 %v468_v61  ;;  %602 = vmatmul.mubr.f32.gmra.mxu0 %v1533_v62  ;;  %v400_v61 = vld [vmem:[#allocation2 + $0x5e8] sm:$0xff] }
  0x9c   : > { %679 = vmatmul.mubr.f32.gmra.mxu1 %v1536_v0  ;;  %743 = vmatprep.subr.mxu0 %v304_v4  ;;  %v315_v4 = vld [vmem:[#allocation2 + $0x340] sm:$0xff] }
  0x9d   : > { %820 = vmatprep.subr.mxu1 %v464_v5  ;;  %744 = vmatpush2.msra.mxu0 %v303_v6  ;;  %v475_v5 = vld [vmem:[#allocation2 + $0x840] sm:$0xff] }
  0x9e   : > { %821 = vmatpush2.msra.mxu1 %v463_v7  ;;  %745 = vmatprep.subr.mxu0 %v299_v8  ;;  %v235_v6 = vld [vmem:[#allocation2 + $0xc0] sm:$0xff]  ;;  %v310_v8 = vld [vmem:[#allocation2 + $0x318] sm:$0xff] }
  0x9f   : > { %822 = vmatprep.subr.mxu1 %v459_v9  ;;  %746 = vmatpush2.msra.mxu0 %v298_v10  ;;  %v395_v7 = vld [vmem:[#allocation2 + $0x5c0] sm:$0xff]  ;;  %v470_v9 = vld [vmem:[#allocation2 + $0x818] sm:$0xff] }
  0xa0   : > { %823 = vmatpush2.msra.mxu1 %v458_v11  ;;  %747 = vmatprep.subr.mxu0 %v294_v12  ;;  %v230_v10 = vld [vmem:[#allocation2 + $0x98] sm:$0xff]  ;;  %v305_v12 = vld [vmem:[#allocation2 + $0x2f0] sm:$0xff] }
  0xa1   : > { %824 = vmatprep.subr.mxu1 %v454_v13  ;;  %748 = vmatpush2.msra.mxu0 %v293_v14  ;;  %v390_v11 = vld [vmem:[#allocation2 + $0x598] sm:$0xff]  ;;  %v465_v13 = vld [vmem:[#allocation2 + $0x7f0] sm:$0xff] }
  0xa2   : > { %749 = vmatprep.mubr.f32.mxu0 %v1511_v63  ;;  %825 = vmatpush2.msra.mxu1 %v453_v15  ;;  %v225_v14 = vld [vmem:[#allocation2 + $0x70] sm:$0xff] }
  0xa3   : > { %826 = vmatprep.mubr.f32.mxu1 %v1514_v1  ;;  %750 = vmatmul.mubr.f32.vlgmr.msra.gmra.mxu0 %v1517_v2  ;;  %v385_v15 = vld [vmem:[#allocation2 + $0x570] sm:$0xff] }
  0xa4   : > { %827 = vmatmul.mubr.f32.vlgmr.msra.gmra.mxu1 %v1520_v3  ;;  %755 = vmatprep.mubr.f32.mxu0 %v1527_v58 }
  0xa5   : > { %832 = vmatprep.mubr.f32.mxu1 %v1530_v59  ;;  %1260 = vmatprep.subr.mxu0 %v370_v16  ;;  %v300_v16 = vld [vmem:[#allocation2 + $0x2c8] sm:$0xff] }
  0xa6   : > { %1298 = vmatprep.subr.mxu1 %v530_v17  ;;  %1261 = vmatpush3.msra.mxu0 %v290_v18  ;;  %v460_v17 = vld [vmem:[#allocation2 + $0x7c8] sm:$0xff] }
  0xa7   : > { %1299 = vmatpush3.msra.mxu1 %v450_v19  ;;  %756 = vmatmul.mubr.f32.gmra.mxu0 %v1533_v62  ;;  %v220_v18 = vld [vmem:[#allocation2 + $0x48] sm:$0xff] }
  0xa8   : > { %833 = vmatmul.mubr.f32.gmra.mxu1 %v1536_v0  ;;  %1262 = vmatprep.subr.mxu0 %v365_v20  ;;  %v380_v19 = vld [vmem:[#allocation2 + $0x548] sm:$0xff]  ;;  %v295_v20 = vld [vmem:[#allocation2 + $0x2a0] sm:$0xff] }
  0xa9   : > { %1300 = vmatprep.subr.mxu1 %v525_v21  ;;  %1263 = vmatpush3.msra.mxu0 %v285_v22  ;;  %v455_v21 = vld [vmem:[#allocation2 + $0x7a0] sm:$0xff] }
  0xaa   : > { %1301 = vmatpush3.msra.mxu1 %v445_v23  ;;  %1264 = vmatprep.subr.mxu0 %v360_v24  ;;  %v215_v22 = vld [vmem:[#allocation2 + $0x20] sm:$0xff] }
  0xab   : > { %1302 = vmatprep.subr.mxu1 %v520_v25  ;;  %1265 = vmatpush3.msra.mxu0 %v280_v26  ;;  %v375_v23 = vld [vmem:[#allocation2 + $0x520] sm:$0xff] }
  0xac   : > { %1303 = vmatpush3.msra.mxu1 %v440_v27  ;;  %1266 = vmatprep.subr.mxu0 %v355_v28 }
  0xad   : > { %1304 = vmatprep.subr.mxu1 %v515_v29  ;;  %1267 = vmatpush3.msra.mxu0 %v275_v30 }
  0xae   : > { %1305 = vmatpush3.msra.mxu1 %v435_v31  ;;  %1268 = vmatprep.subr.mxu0 %v350_v32 }
  0xaf   : > { %1306 = vmatprep.subr.mxu1 %v510_v33  ;;  %1269 = vmatpush3.msra.mxu0 %v270_v34 }
  0xb0   : > { %1307 = vmatpush3.msra.mxu1 %v430_v35  ;;  %1270 = vmatprep.subr.mxu0 %v345_v36 }
  0xb1   : > { %1308 = vmatprep.subr.mxu1 %v505_v37  ;;  %1271 = vmatpush3.msra.mxu0 %v265_v38 }
  0xb2   : > { %1309 = vmatpush3.msra.mxu1 %v425_v39  ;;  %1272 = vmatprep.subr.mxu0 %v340_v40 }
  0xb3   : > { %1310 = vmatprep.subr.mxu1 %v500_v41  ;;  %1273 = vmatpush3.msra.mxu0 %v260_v42 }
  0xb4   : > { %1311 = vmatpush3.msra.mxu1 %v420_v43  ;;  %1274 = vmatprep.subr.mxu0 %v335_v44 }
  0xb5   : > { %1312 = vmatprep.subr.mxu1 %v495_v45  ;;  %1275 = vmatpush3.msra.mxu0 %v255_v46 }
  0xb6   : > { %1313 = vmatpush3.msra.mxu1 %v415_v47  ;;  %1276 = vmatprep.subr.mxu0 %v330_v48 }
  0xb7   : > { %1314 = vmatprep.subr.mxu1 %v490_v49  ;;  %1277 = vmatpush3.msra.mxu0 %v250_v50 }
  0xb8   : > { %1315 = vmatpush3.msra.mxu1 %v410_v51  ;;  %1278 = vmatprep.subr.mxu0 %v325_v52 }
  0xb9   : > { %1316 = vmatprep.subr.mxu1 %v485_v53  ;;  %1279 = vmatpush3.msra.mxu0 %v245_v54 }
  0xba   : > { %1317 = vmatpush3.msra.mxu1 %v405_v55  ;;  %1280 = vmatprep.subr.mxu0 %v320_v56 }
  0xbb   : > { %1318 = vmatprep.subr.mxu1 %v480_v57  ;;  %1281 = vmatpush3.msra.mxu0 %v240_v60 }
  0xbc   : > { %1319 = vmatpush3.msra.mxu1 %v400_v61  ;;  %1282 = vmatprep.subr.mxu0 %v315_v4 }
  0xbd   : > { %1320 = vmatprep.subr.mxu1 %v475_v5  ;;  %1283 = vmatpush3.msra.mxu0 %v235_v6 }
  0xbe   : > { %1321 = vmatpush3.msra.mxu1 %v395_v7  ;;  %1284 = vmatprep.subr.mxu0 %v310_v8 }
  0xbf   : > { %1322 = vmatprep.subr.mxu1 %v470_v9  ;;  %1285 = vmatpush3.msra.mxu0 %v230_v10 }
  0xc0   : > { %1323 = vmatpush3.msra.mxu1 %v390_v11  ;;  %1286 = vmatprep.subr.mxu0 %v305_v12 }
  0xc1   : > { %1324 = vmatprep.subr.mxu1 %v465_v13  ;;  %1287 = vmatpush3.msra.mxu0 %v225_v14 }
  0xc2   : > { %1325 = vmatpush3.msra.mxu1 %v385_v15  ;;  %1288 = vmatprep.subr.mxu0 %v300_v16 }
  0xc3   : > { %1326 = vmatprep.subr.mxu1 %v460_v17  ;;  %1289 = vmatpush3.msra.mxu0 %v220_v18 }
  0xc4   : > { %1327 = vmatpush3.msra.mxu1 %v380_v19  ;;  %1290 = vmatprep.subr.mxu0 %v295_v20 }
  0xc5   : > { %1328 = vmatprep.subr.mxu1 %v455_v21  ;;  %1291 = vmatpush3.msra.mxu0 %v215_v22 }
  0xc6   : > { %903 = vmatprep.mubr.f32.mxu0 %v1511_v63  ;;  %1329 = vmatpush3.msra.mxu1 %v375_v23 }
  0xc7   : > { %978 = vmatprep.mubr.f32.mxu1 %v1514_v1  ;;  %904 = vmatmul.mubr.f32.vlgmr.msra.gmra.mxu0 %v1517_v2 }
  0xc8   : > { %979 = vmatmul.mubr.f32.vlgmr.msra.gmra.mxu1 %v1520_v3  ;;  %908 = vmatprep.mubr.f32.mxu0 %v1527_v58 }
  0xc9   : > { %983 = vmatprep.mubr.f32.mxu1 %v1530_v59 }
  0xcb   : > { %909 = vmatmul.mubr.f32.gmra.mxu0 %v1533_v62 }
  0xcc   : > { %984 = vmatmul.mubr.f32.gmra.mxu1 %v1536_v0 }
 0x11f   : > { %v597_v24 = vpop.f32.mrf.mxu0 }
 0x120   : > { %v674_v25 = vpop.f32.mrf.mxu1 }
 0x121   : > { %v599_v26 = vpop.f32.mrf.mxu0  ;;  %v1558_v30 = vadd.f32 %v674_v25, %v597_v24 }
 0x122   : > { %v676_v27 = vpop.f32.mrf.mxu1 }
 0x123   : > { %v1560_v31 = vadd.f32 %v676_v27, %v599_v26  ;;  %v1565_v0 = vand.u32 2147483647, %v1558_v30  ;;  %vm1105_vm8 = vcmp.lt.f32.partialorder %v1558_v30, 0.0 }
 0x125   : > { %v1575_v37 = vand.u32 2147483647, %v1560_v31  ;;  %vm1106_vm9 = vcmp.lt.f32.partialorder %v1560_v31, 0.0 }
 0x15b   : > { %v603_v63 = vpop.f32.mrf.mxu0 }
 0x15c   : > { %v680_v28 = vpop.f32.mrf.mxu1 }
 0x15d   : > { %v605_v29 = vpop.f32.mrf.mxu0  ;;  %v1572_v34 = vadd.f32 %v680_v28, %v603_v63 }
 0x15e   : > { %v682_v1 = vpop.f32.mrf.mxu1 }
 0x15f   : > { %v1584_v43 = vadd.f32 %v682_v1, %v605_v29  ;;  %v1589_v45 = vand.u32 2147483647, %v1572_v34  ;;  %vm1107_vm12 = vcmp.lt.f32.partialorder %v1572_v34, 0.0 }
 0x161   : > { %v1599_v51 = vand.u32 2147483647, %v1584_v43  ;;  %vm1108_vm15 = vcmp.lt.f32.partialorder %v1584_v43, 0.0 }
 0x163   : > { %v751_v2 = vpop.f32.mrf.mxu0 }
 0x164   : > { %v828_v3 = vpop.f32.mrf.mxu1 }
 0x165   : > { %v1562_v58 = vadd.f32 %v828_v3, %v751_v2  ;;  %v753_v59 = vpop.f32.mrf.mxu0 }
 0x166   : > { %v830_v62 = vpop.f32.mrf.mxu1 }
 0x167   : > { %v1568_v32 = vand.u32 2147483647, %v1562_v58  ;;  %v1570_v33 = vadd.f32 %v830_v62, %v753_v59  ;;  %v757_v35 = vpop.f32.mrf.mxu0  ;;  %vm1117_vm11 = vcmp.lt.f32.partialorder %v1562_v58, 0.0 }
 0x168   : > { %v834_v36 = vpop.f32.mrf.mxu1 }
 0x169   : > { %v997_v38 = vmax.f32 %v1565_v0, %v1568_v32  ;;  %v1580_v39 = vand.u32 2147483647, %v1570_v33  ;;  %v1582_v40 = vadd.f32 %v834_v36, %v757_v35  ;;  %v759_v41 = vpop.f32.mrf.mxu0  ;;  %v1001_v56 = vmin.f32 %v1565_v0, %v1568_v32 }
 0x16a   : > { %v836_v42 = vpop.f32.mrf.mxu1  ;;  %vm1093_vm6 = vcmp.gt.f32.partialorder %v1568_v32, %v1565_v0  ;;  %vm1118_vm13 = vcmp.lt.f32.partialorder %v1570_v33, 0.0 }
 0x16b   : > { %vm1005_vm0 = vcmp.eq.f32.partialorder %v997_v38, 0.0  ;;  %v998_v44 = vmax.f32 %v1575_v37, %v1580_v39  ;;  %v1592_v47 = vand.u32 2147483647, %v1582_v40  ;;  %v1594_v48 = vadd.f32 %v836_v42, %v759_v41 }
 0x16c   : > { %v1009_v46 = vsel %vm1005_vm0, 1.0, %v997_v38  ;;  %v1002_v61 = vmin.f32 %v1575_v37, %v1580_v39  ;;  %vm1094_vm7 = vcmp.gt.f32.partialorder %v1580_v39, %v1575_v37  ;;  %vm1119_vm0 = vcmp.lt.f32.partialorder %v1582_v40, 0.0 }
 0x16d   : > { %1375 = vrcp.f32 %v1009_v46  ;;  %vm1006_vm1 = vcmp.eq.f32.partialorder %v998_v44, 0.0  ;;  %v999_v50 = vmax.f32 %v1589_v45, %v1592_v47  ;;  %v1602_v52 = vand.u32 2147483647, %v1594_v48 }
 0x16e   : > { %v1010_v49 = vsel %vm1006_vm1, 1.0, %v998_v44  ;;  %v1003_v7 = vmin.f32 %v1589_v45, %v1592_v47  ;;  %vm1095_vm10 = vcmp.gt.f32.partialorder %v1592_v47, %v1589_v45  ;;  %vm1120_vm1 = vcmp.lt.f32.partialorder %v1594_v48, 0.0 }
 0x16f   : > { %1377 = vrcp.f32 %v1010_v49  ;;  %vm1007_vm2 = vcmp.eq.f32.partialorder %v999_v50, 0.0  ;;  %v1000_v54 = vmax.f32 %v1599_v51, %v1602_v52  ;;  %v1004_v14 = vmin.f32 %v1599_v51, %v1602_v52 }
 0x170   : > { %v1011_v53 = vsel %vm1007_vm2, 1.0, %v999_v50  ;;  %vm1096_vm14 = vcmp.gt.f32.partialorder %v1602_v52, %v1599_v51 }
 0x171   : > { %1379 = vrcp.f32 %v1011_v53  ;;  %vm1008_vm3 = vcmp.eq.f32.partialorder %v1000_v54, 0.0 }
 0x172   : > { %v1012_v55 = vsel %vm1008_vm3, 1.0, %v1000_v54 }
 0x173   : > { %1381 = vrcp.f32 %v1012_v55 }
 0x17a   : > { %v1376_v57 = vpop.eup %1375 }
 0x17b   : > { %v1608_v60 = vmul.f32 %v1376_v57, %v1001_v56 }
 0x17c   : > { %v1378_v4 = vpop.eup %1377 }
 0x17d   : > { %v1614_v5 = vmul.f32 %v1608_v60, %v1608_v60  ;;  %v1616_v6 = vmul.f32 %v1378_v4, %v1002_v61 }
 0x17e   : > { %v1380_v8 = vpop.eup %1379 }
 0x17f   : > { %v1025_v9 = vmul.f32 0.002823639, %v1614_v5  ;;  %v1623_v10 = vmul.f32 %v1616_v6, %v1616_v6  ;;  %v1625_v11 = vmul.f32 %v1380_v8, %v1003_v7 }
 0x180   : > { %v1382_v15 = vpop.eup %1381 }
 0x181   : > { %v1029_v12 = vadd.f32 -0.015956903, %v1025_v9  ;;  %v1026_v13 = vmul.f32 0.002823639, %v1623_v10  ;;  %v1632_v16 = vmul.f32 %v1625_v11, %v1625_v11  ;;  %v1635_v19 = vmul.f32 %v1382_v15, %v1004_v14 }
 0x183   : > { %v1033_v17 = vmul.f32 %v1029_v12, %v1614_v5  ;;  %v1030_v18 = vadd.f32 -0.015956903, %v1026_v13  ;;  %v1027_v20 = vmul.f32 0.002823639, %v1632_v16  ;;  %v1641_v23 = vmul.f32 %v1635_v19, %v1635_v19 }
 0x185   : > { %v1037_v21 = vadd.f32 0.04250499, %v1033_v17  ;;  %v1034_v22 = vmul.f32 %v1030_v18, %v1623_v10  ;;  %v1031_v24 = vadd.f32 -0.015956903, %v1027_v20  ;;  %v1028_v27 = vmul.f32 0.002823639, %v1641_v23 }
 0x186   : > { %v1440_v20 = vmov 0.0  }
 0x187   : > { %v1041_v25 = vmul.f32 %v1037_v21, %v1614_v5  ;;  %v1038_v26 = vadd.f32 0.04250499, %v1034_v22  ;;  %v1035_v63 = vmul.f32 %v1031_v24, %v1632_v16  ;;  %v1292_v28 = vpop.f32.mrf.mxu0  ;;  %v1032_v3 = vadd.f32 -0.015956903, %v1028_v27 }
 0x188   : > { %v1330_v29 = vpop.f32.mrf.mxu1 }
 0x189   : > { %v1045_v1 = vadd.f32 -0.07489009, %v1041_v25  ;;  %v1042_v2 = vmul.f32 %v1038_v26, %v1623_v10  ;;  %v1039_v59 = vadd.f32 0.04250499, %v1035_v63  ;;  %v1293_v62 = vpop.f32.mrf.mxu0  ;;  %v1036_v41 = vmul.f32 %v1032_v3, %v1641_v23 }
 0x18a   : > { %v1331_v35 = vpop.f32.mrf.mxu1  ;;  %v1294_v42 = vadd.f32 %v1293_v62, %v1292_v28 }
 0x18b   : > { %v1049_v36 = vmul.f32 %v1045_v1, %v1614_v5  ;;  %v1046_v38 = vadd.f32 -0.07489009, %v1042_v2  ;;  %v1043_v44 = vmul.f32 %v1039_v59, %v1632_v16  ;;  %v1332_v46 = vadd.f32 %v1331_v35, %v1330_v29  ;;  %v1295_v49 = vpop.f32.mrf.mxu0 }
 0x18c   : > { %v1333_v50 = vpop.f32.mrf.mxu1  ;;  %v1040_v55 = vadd.f32 0.04250499, %v1036_v41 }
 0x18d   : > { %v1053_v53 = vadd.f32 0.10634793, %v1049_v36  ;;  %v1050_v54 = vmul.f32 %v1046_v38, %v1623_v10  ;;  %v1047_v56 = vadd.f32 -0.07489009, %v1043_v44  ;;  %v981_v57 = vadd.f32 %v1332_v46, %v1294_v42  ;;  %v1296_v61 = vpop.f32.mrf.mxu0 }
 0x18e   : > { %v1334_v4 = vpop.f32.mrf.mxu1  ;;  %v1044_v9 = vmul.f32 %v1040_v55, %v1641_v23  ;;  %v1297_v12 = vadd.f32 %v1296_v61, %v1295_v49 }
 0x18f   : > { %v1057_v7 = vmul.f32 %v1053_v53, %v1614_v5  ;;  %v1054_v8 = vadd.f32 0.10634793, %v1050_v54  ;;  %v1051_v13 = vmul.f32 %v1047_v56, %v1632_v16  ;;  %vm1129_vm4 = vcmp.lt.f32.partialorder %v981_v57, 0.0 }
 0x190   : > { %v1335_v14 = vadd.f32 %v1334_v4, %v1333_v50  ;;  %v1048_v18 = vadd.f32 -0.07489009, %v1044_v9  ;;  %v1131_v21 = vsel %vm1129_vm4, 3.1415927, %v1440_v20 }
 0x191   : > { %v1061_v15 = vadd.f32 -0.14202736, %v1057_v7  ;;  %v1058_v17 = vmul.f32 %v1054_v8, %v1623_v10  ;;  %v1055_v22 = vadd.f32 0.10634793, %v1051_v13  ;;  %1135 = vst [vmem:[%s1655_s30 + $0x10] sm:$0xff] %v1131_v21 }
 0x192   : > { %v986_v24 = vadd.f32 %v1335_v14, %v1297_v12  ;;  %v1052_v27 = vmul.f32 %v1048_v18, %v1641_v23 }
 0x193   : > { %v1065_v25 = vmul.f32 %v1061_v15, %v1614_v5  ;;  %v1062_v26 = vadd.f32 -0.14202736, %v1058_v17  ;;  %v1059_v63 = vmul.f32 %v1055_v22, %v1632_v16 }
 0x194   : > { %vm1130_vm5 = vcmp.lt.f32.partialorder %v986_v24, 0.0  ;;  %v1056_v1 = vadd.f32 0.10634793, %v1052_v27 }
 0x195   : > { %v1069_v28 = vadd.f32 0.19992696, %v1065_v25  ;;  %v1066_v29 = vmul.f32 %v1062_v26, %v1623_v10  ;;  %v1132_v2 = vsel %vm1130_vm5, 3.1415927, %v1440_v20  ;;  %v1063_v3 = vadd.f32 -0.14202736, %v1059_v63 }
 0x196   : > { %1138 = vst [vmem:[%s1655_s30 + $0x28] sm:$0x1] %v1132_v2  ;;  %v1060_v35 = vmul.f32 %v1056_v1, %v1641_v23 }
 0x197   : > { %v1073_v59 = vmul.f32 %v1069_v28, %v1614_v5  ;;  %v1070_v62 = vadd.f32 0.19992696, %v1066_v29  ;;  %v1067_v36 = vmul.f32 %v1063_v3, %v1632_v16 }
 0x198   : > { %v1064_v42 = vadd.f32 -0.14202736, %v1060_v35 }
 0x199   : > { %v1077_v38 = vadd.f32 -0.33333102, %v1073_v59  ;;  %v1074_v41 = vmul.f32 %v1070_v62, %v1623_v10  ;;  %v1071_v44 = vadd.f32 0.19992696, %v1067_v36 }
 0x19a   : > { %v1068_v50 = vmul.f32 %v1064_v42, %v1641_v23 }
 0x19b   : > { %v1081_v46 = vmul.f32 %v1077_v38, %v1614_v5  ;;  %v1078_v49 = vadd.f32 -0.33333102, %v1074_v41  ;;  %v1075_v53 = vmul.f32 %v1071_v44, %v1632_v16 }
 0x19c   : > { %v1072_v56 = vadd.f32 0.19992696, %v1068_v50 }
 0x19d   : > { %v1085_v54 = vmul.f32 %v1081_v46, %v1608_v60  ;;  %v1082_v55 = vmul.f32 %v1078_v49, %v1623_v10  ;;  %v1079_v57 = vadd.f32 -0.33333102, %v1075_v53 }
 0x19e   : > { %v1076_v7 = vmul.f32 %v1072_v56, %v1641_v23 }
 0x19f   : > { %v1089_v61 = vadd.f32 %v1085_v54, %v1608_v60  ;;  %v1086_v4 = vmul.f32 %v1082_v55, %v1616_v6  ;;  %v1083_v8 = vmul.f32 %v1079_v57, %v1632_v16 }
 0x1a0   : > { %v1080_v12 = vadd.f32 -0.33333102, %v1076_v7 }
 0x1a1   : > { %v1097_v5 = vsub.f32 1.5707964, %v1089_v61  ;;  %v1090_v9 = vadd.f32 %v1086_v4, %v1616_v6  ;;  %v1087_v13 = vmul.f32 %v1083_v8, %v1625_v11 }
 0x1a2   : > { %v1084_v15 = vmul.f32 %v1080_v12, %v1641_v23 }
 0x1a3   : > { %v1101_v10 = vsel %vm1093_vm6, %v1097_v5, %v1089_v61  ;;  %v1098_v14 = vsub.f32 1.5707964, %v1090_v9  ;;  %v1091_v17 = vadd.f32 %v1087_v13, %v1625_v11 }
 0x1a4   : > { %v1109_v60 = vsub.f32 3.1415927, %v1101_v10  ;;  %v1088_v6 = vmul.f32 %v1084_v15, %v1635_v19 }
 0x1a5   : > { %v1102_v16 = vsel %vm1094_vm7, %v1098_v14, %v1090_v9  ;;  %v1099_v32 = vsub.f32 1.5707964, %v1091_v17 }
 0x1a6   : > { %v1113_v18 = vsel %vm1105_vm8, %v1109_v60, %v1101_v10  ;;  %v1110_v0 = vsub.f32 3.1415927, %v1102_v16  ;;  %v1092_v37 = vadd.f32 %v1088_v6, %v1635_v19 }
 0x1a7   : > { %v1121_v20 = vsub.f32 0.0, %v1113_v18  ;;  %v1103_v30 = vsel %vm1095_vm10, %v1099_v32, %v1091_v17 }
 0x1a8   : > { %v1114_v39 = vsel %vm1106_vm9, %v1110_v0, %v1102_v16  ;;  %v1111_v21 = vsub.f32 3.1415927, %v1103_v30  ;;  %v1100_v22 = vsub.f32 1.5707964, %v1092_v37 }
 0x1a9   : > { %v1125_v11 = vsel %vm1117_vm11, %v1121_v20, %v1113_v18  ;;  %v1122_v23 = vsub.f32 0.0, %v1114_v39 }
 0x1aa   : > { %1133 = vst [vmem:[%s1655_s30] sm:$0xff] %v1125_v11  ;;  %v1115_v45 = vsel %vm1107_vm12, %v1111_v21, %v1103_v30  ;;  %v1104_v47 = vsel %vm1096_vm14, %v1100_v22, %v1092_v37 }
 0x1ab   : > { %v1126_v31 = vsel %vm1118_vm13, %v1122_v23, %v1114_v39  ;;  %v1123_v58 = vsub.f32 0.0, %v1115_v45  ;;  %v1112_v19 = vsub.f32 3.1415927, %v1104_v47 }
 0x1ac   : > { %1134 = vst [vmem:[%s1655_s30 + $0x8] sm:$0xff] %v1126_v31 }
 0x1ad   : > { %v1127_v24 = vsel %vm1119_vm0, %v1123_v58, %v1115_v45  ;;  %v1116_v25 = vsel %vm1108_vm15, %v1112_v19, %v1104_v47 }
 0x1ae   : > { %1136 = vst [vmem:[%s1655_s30 + $0x18] sm:$0x1] %v1127_v24  ;;  %v1124_v34 = vsub.f32 0.0, %v1116_v25 }
 0x1b0   : > { %v1128_v33 = vsel %vm1120_vm1, %v1124_v34, %v1116_v25 }
 0x1b1   : > { %1137 = vst [vmem:[%s1655_s30 + $0x20] sm:$0x1] %v1128_v33 }
 0x1b2 PF: > { %s13_s11 = sadd.s32 1, %s1435_s11   ;;  %s1720_s9 = smov %s1431_s10 }
 0x1b3   : > { %p10_p2 = scmp.ge.s32.totalorder %s13_s11, 4   ;;  %s1721_s10 = smov %s1723_s13 }
 0x1b5   :  { %12 = sbr.rel (!%p10_p2) target bundleno = 2 (0x2), region = 63 }
 0x1ba   :  { %1171 = vsyncpa [#allocation3], 1 }
 0x1bb   :  { %1173 = vsyncpa [#allocation3 + $0x1], 1 }

</bundles_post_ra>
